<compile_context>
chip_gen: v7x
topology: tpu7x:2x2x1
jax: 0.10.0
libtpu: 0.0.40
codegen_flags: <defaults>
</compile_context>

<pallas_src>
import jax
import jax.numpy as jnp
from jax.experimental import pallas as pl
from jax.experimental.pallas import tpu as pltpu

N_EMBD = 10
HIDDEN = 4 * N_EMBD  # 40


def _round_up(n, m):
    return ((n + m - 1) // m) * m


def _ffn_kernel(x_ref, w1_ref, b1_ref, w2_ref, b2_ref, o_ref):
    # x_ref:  (TM, C)   native dtype (streamed row tiles)
    # w1_ref: (C,  HP)  native dtype (VMEM-resident; hidden padded to 128)
    # b1_ref: (1,  HP)  float32
    # w2_ref: (HP, C)   native dtype (VMEM-resident; un-padded output dim)
    # b2_ref: (1,  C)   float32
    # o_ref:  (TM, C)   output dtype (un-padded writeback)
    x = x_ref[...]
    # First GEMM on MXU, f32 accumulation; bias + ReLU epilogue stays in f32.
    h = jnp.dot(x, w1_ref[...], preferred_element_type=jnp.float32) + b1_ref[...]
    h = jnp.maximum(h, 0.0)  # ReLU (padded hidden cols are relu(0) = 0)
    # Second GEMM: feed the MXU in the weight dtype, accumulate in f32.
    y = jnp.dot(h.astype(w2_ref.dtype), w2_ref[...],
                preferred_element_type=jnp.float32) + b2_ref[...]
    # Dropout(p=0.0) == identity.
    o_ref[...] = y.astype(o_ref.dtype)


def prepare_params(w1, b1, w2, b2):
    """One-time parameter prep (outside the hot path).

    Weights are stored (in, out) (transposed vs. PyTorch's (out, in)).
    Pads the hidden dim to a multiple of 128 with zeros (mathematically inert)
    and casts biases to f32.  Output dim C is left un-padded.
    """
    C, H = w1.shape
    assert w2.shape == (H, C) and b1.shape == (H,) and b2.shape == (C,)
    HP = _round_up(H, 128)
    w1p = jnp.pad(w1, ((0, 0), (0, HP - H)))
    w2p = jnp.pad(w2, ((0, HP - H), (0, 0)))
    b1p = jnp.pad(b1.astype(jnp.float32), (0, HP - H)).reshape(1, HP)
    b2p = b2.astype(jnp.float32).reshape(1, C)
    return w1p, b1p, w2p, b2p


def _choose_row_tile(M, block_rows):
    """Row tile: full M for small inputs (no (8,128) constraint when block ==
    full dim), otherwise a multiple of 8 with an even grid-step count so both
    v7x TensorCores get balanced work."""
    if M <= block_rows:
        return M
    tm = max(8, (block_rows // 8) * 8)
    n = pl.cdiv(M, tm)
    if n > 1 and n % 2 == 1:
        tm = max(8, _round_up(pl.cdiv(M, n + 1), 8))
    return tm


def feedforward(x, w1p, b1p, w2p, b2p, *, block_rows=4096):
    """x: (B, T, C); params as returned by prepare_params. Returns (B, T, C)."""
    B, T, C = x.shape
    HP = w1p.shape[1]
    assert w1p.shape == (C, HP) and w2p.shape == (HP, C)
    assert b1p.shape == (1, HP) and b2p.shape == (1, C)
    M = B * T

    TM = _choose_row_tile(M, block_rows)
    grid = (pl.cdiv(M, TM),)

    x2d = x.reshape(M, C)  # no row/feature padding; ragged last block is masked

    H = HIDDEN
    flops = 2 * M * (C * H + H * C)
    bytes_accessed = (
        x2d.size * x2d.dtype.itemsize
        + w1p.size * w1p.dtype.itemsize
        + w2p.size * w2p.dtype.itemsize
        + (b1p.size + b2p.size) * 4
        + M * C * jnp.dtype(x.dtype).itemsize
    )

    out2d = pl.pallas_call(
        _ffn_kernel,
        out_shape=jax.ShapeDtypeStruct((M, C), x.dtype),
        grid=grid,
        in_specs=[
            pl.BlockSpec((TM, C), lambda i: (i, 0)),    # x: streamed row tiles
            pl.BlockSpec((C, HP), lambda i: (0, 0)),    # w1: VMEM-resident
            pl.BlockSpec((1, HP), lambda i: (0, 0)),    # b1: VMEM-resident
            pl.BlockSpec((HP, C), lambda i: (0, 0)),    # w2: VMEM-resident
            pl.BlockSpec((1, C), lambda i: (0, 0)),     # b2: VMEM-resident
        ],
        out_specs=pl.BlockSpec((TM, C), lambda i: (i, 0)),  # un-padded writeback
        compiler_params=pltpu.CompilerParams(
            dimension_semantics=("parallel",),   # both TCs on v7x
            vmem_limit_bytes=64 * 1024 * 1024,   # let big row tiles land on v5e
        ),
        cost_estimate=pl.CostEstimate(
            flops=flops, transcendentals=0, bytes_accessed=bytes_accessed),
    )(x2d, w1p, b1p, w2p, b2p)

    return out2d.reshape(B, T, C)


def init_params(key, n_embd=N_EMBD):
    """Deterministic init mimicking torch.nn.Linear (uniform +/- 1/sqrt(fan_in)).
    Weights stored as (in, out)."""
    k1, k2, k3, k4 = jax.random.split(key, 4)
    hidden = 4 * n_embd
    bound1 = 1.0 / (n_embd ** 0.5)
    bound2 = 1.0 / (hidden ** 0.5)
    w1 = jax.random.uniform(k1, (n_embd, hidden), jnp.float32, -bound1, bound1)
    b1 = jax.random.uniform(k2, (hidden,), jnp.float32, -bound1, bound1)
    w2 = jax.random.uniform(k3, (hidden, n_embd), jnp.float32, -bound2, bound2)
    b2 = jax.random.uniform(k4, (n_embd,), jnp.float32, -bound2, bound2)
    return w1, b1, w2, b2


if __name__ == "__main__":
    key = jax.random.PRNGKey(0)
    kx, kp = jax.random.split(key)

    B, T, C = 2, 8, N_EMBD
    x = jax.random.normal(kx, (B, T, C), dtype=jnp.float32)
    w1, b1, w2, b2 = init_params(kp)

    # One-time parameter prep (hoisted out of the hot path).
    w1p, b1p, w2p, b2p = prepare_params(w1, b1, w2, b2)

    y = feedforward(x, w1p, b1p, w2p, b2p)
    jax.block_until_ready(y)

    # Reference check in plain JAX (same math; Dropout(p=0) is identity).
    ref = jnp.maximum(x @ w1 + b1, 0.0) @ w2 + b2
    assert y.shape == (B, T, C)
    assert jnp.allclose(y, ref, atol=1e-5, rtol=1e-5)

    print("KERNEL_OK")
</pallas_src>

<mosaic_0001>
module attributes {stable_mosaic.version = 11 : i64} {
  func.func @_ffn_kernel(%arg0: i32, %arg1: memref<16x10xf32, #tpu.memory_space<vmem>>, %arg2: memref<10x128xf32, #tpu.memory_space<vmem>>, %arg3: memref<1x128xf32, #tpu.memory_space<vmem>>, %arg4: memref<128x10xf32, #tpu.memory_space<vmem>>, %arg5: memref<1x10xf32, #tpu.memory_space<vmem>>, %arg6: memref<16x10xf32, #tpu.memory_space<vmem>>) attributes {dimension_semantics = [#tpu.dimension_semantics<parallel>], iteration_bounds = array<i64: 1>, scalar_prefetch = 0 : i64, scratch_operands = 0 : i64, tpu.core_type = #tpu.core_type<tc>, window_params = [{transform_indices = @transform_0, window_bounds = array<i64: 16, 10>}, {pipeline_mode = #tpu.pipeline_mode<synchronous>, transform_indices = @transform_1, window_bounds = array<i64: 10, 128>}, {pipeline_mode = #tpu.pipeline_mode<synchronous>, transform_indices = @transform_2, window_bounds = array<i64: 1, 128>}, {pipeline_mode = #tpu.pipeline_mode<synchronous>, transform_indices = @transform_3, window_bounds = array<i64: 128, 10>}, {pipeline_mode = #tpu.pipeline_mode<synchronous>, transform_indices = @transform_4, window_bounds = array<i64: 1, 10>}, {transform_indices = @transform_5, window_bounds = array<i64: 16, 10>}]} {
    %c0 = arith.constant 0 : index
    %c0_0 = arith.constant 0 : index
    %0 = vector.load %arg1[%c0, %c0_0] : memref<16x10xf32, #tpu.memory_space<vmem>>, vector<16x10xf32>
    %c0_1 = arith.constant 0 : index
    %c0_2 = arith.constant 0 : index
    %1 = vector.load %arg2[%c0_1, %c0_2] : memref<10x128xf32, #tpu.memory_space<vmem>>, vector<10x128xf32>
    %cst = arith.constant dense<0.000000e+00> : vector<16x128xf32>
    %2 = tpu.matmul %0, %1, %cst {dimension_numbers = #tpu.dot_dimension_numbers<[1], [0], [0], [1], [0, 0, 1, 1], [], []>} : vector<16x10xf32>, vector<10x128xf32>, vector<16x128xf32> -> vector<16x128xf32>
    %c0_3 = arith.constant 0 : index
    %c0_4 = arith.constant 0 : index
    %3 = vector.load %arg3[%c0_3, %c0_4] : memref<1x128xf32, #tpu.memory_space<vmem>>, vector<1x128xf32>
    %4 = vector.broadcast %3 : vector<1x128xf32> to vector<16x128xf32>
    %5 = arith.addf %2, %4 : vector<16x128xf32>
    %cst_5 = arith.constant 0.000000e+00 : f32
    %6 = vector.broadcast %cst_5 : f32 to vector<16x128xf32>
    %7 = arith.maximumf %5, %6 : vector<16x128xf32>
    %c0_6 = arith.constant 0 : index
    %c0_7 = arith.constant 0 : index
    %8 = vector.load %arg4[%c0_6, %c0_7] : memref<128x10xf32, #tpu.memory_space<vmem>>, vector<128x10xf32>
    %cst_8 = arith.constant dense<0.000000e+00> : vector<16x10xf32>
    %9 = tpu.matmul %7, %8, %cst_8 {dimension_numbers = #tpu.dot_dimension_numbers<[1], [0], [0], [1], [0, 0, 1, 1], [], []>} : vector<16x128xf32>, vector<128x10xf32>, vector<16x10xf32> -> vector<16x10xf32>
    %c0_9 = arith.constant 0 : index
    %c0_10 = arith.constant 0 : index
    %10 = vector.load %arg5[%c0_9, %c0_10] : memref<1x10xf32, #tpu.memory_space<vmem>>, vector<1x10xf32>
    %11 = vector.broadcast %10 : vector<1x10xf32> to vector<16x10xf32>
    %12 = arith.addf %9, %11 : vector<16x10xf32>
    %c0_11 = arith.constant 0 : index
    %c0_12 = arith.constant 0 : index
    %13 = vector.load %arg6[%c0_11, %c0_12] : memref<16x10xf32, #tpu.memory_space<vmem>>, vector<16x10xf32>
    tpu.vector_store %arg6[%c0_11, %c0_12], %12 {strides = array<i32>} : memref<16x10xf32, #tpu.memory_space<vmem>>, vector<16x10xf32>,
    return
  }
  func.func @transform_0(%arg0: i32) -> (i32, i32) {
    %c0_i32 = arith.constant 0 : i32
    %c0_i32_0 = arith.constant 0 : i32
    return %arg0, %c0_i32 : i32, i32
  }
  func.func @transform_1(%arg0: i32) -> (i32, i32) {
    %c0_i32 = arith.constant 0 : i32
    %c0_i32_0 = arith.constant 0 : i32
    %c0_i32_1 = arith.constant 0 : i32
    return %c0_i32, %c0_i32_0 : i32, i32
  }
  func.func @transform_2(%arg0: i32) -> (i32, i32) {
    %c0_i32 = arith.constant 0 : i32
    %c0_i32_0 = arith.constant 0 : i32
    %c0_i32_1 = arith.constant 0 : i32
    return %c0_i32, %c0_i32_0 : i32, i32
  }
  func.func @transform_3(%arg0: i32) -> (i32, i32) {
    %c0_i32 = arith.constant 0 : i32
    %c0_i32_0 = arith.constant 0 : i32
    %c0_i32_1 = arith.constant 0 : i32
    return %c0_i32, %c0_i32_0 : i32, i32
  }
  func.func @transform_4(%arg0: i32) -> (i32, i32) {
    %c0_i32 = arith.constant 0 : i32
    %c0_i32_0 = arith.constant 0 : i32
    %c0_i32_1 = arith.constant 0 : i32
    return %c0_i32, %c0_i32_0 : i32, i32
  }
  func.func @transform_5(%arg0: i32) -> (i32, i32) {
    %c0_i32 = arith.constant 0 : i32
    %c0_i32_0 = arith.constant 0 : i32
    return %arg0, %c0_i32 : i32, i32
  }
}

</mosaic_0001>

<bundles_post_ra>
// kernel: tpu_custom_call.1
= control target key start
LH: loop header
LB: loop body
LE: loop exit
PB: predicated region body
PF: predicated region fallthrough
CT: control target
= control target key end

     0   :  { %10 = vsyncpa [#allocation3], 0  ;;  %s693_s0 = inlined_call_operand.hbm [shape: f32[16,10], index: 0, kind: input, shape index: {}]   ;;  %s694_s1 = inlined_call_operand.hbm [shape: f32[10,128], index: 1, kind: input, shape index: {}]   ;;  %s695_s2 = inlined_call_operand.hbm [shape: f32[1,128], index: 2, kind: input, shape index: {}]   ;;  %s696_s3 = inlined_call_operand.hbm [shape: f32[128,10], index: 3, kind: input, shape index: {}]   ;;  %s697_s4 = inlined_call_operand.hbm [shape: f32[1,10], index: 4, kind: input, shape index: {}]   ;;  %s698_s5 = inlined_call_operand.hbm [shape: f32[16,10], index: 5, kind: output, shape index: {}]  }
   0x1   :  { %11 = vsyncpa [#allocation6], 0 }
   0x2   :  { %12 = vsyncpa [#allocation9], 0 }
   0x3   :  { %13 = vsyncpa [#allocation4], 0  ;;  %s559_s18 = smov [#allocation5]   ;;  %s560_s20 = smov [#allocation8]  }
   0x4   :  { %s31_s19 = sshll.u32 %s559_s18, 4  ;;  %s53_s21 = sshll.u32 %s560_s20, 4  ;;  %s32_s19 = int_to_ptr.vmem [resolvable:$true] %s31_s19  ;;  %s598_s21 = int_to_ptr.vmem [resolvable:$true] %s53_s21 }
   0x5   :  { %s419_s24 = scalar_lea.hbm %s694_s1, 256 }
   0x6   :  { %p420_p0 = scmp.ne.s32.totalorder %s694_s1, %s419_s24  ;;  %p423_p1 = scmp.lt.u32.totalorder %s419_s24, %s694_s1 }
   0x8   :  { %p425_p2 = pnand %p423_p1, %p420_p0 }
   0xa   :  { %428 = shalt.err (!%p425_p2)
}
   0xb   :  { %s429_s29 = scalar_lea.vmem %s32_s19, 256  ;;  %p434_p4 = scmp.lt.s32.totalorder %s32_s19, %s32_s19 }
   0xc   :  { %p430_p3 = scmp.ne.s32.totalorder %s32_s19, %s429_s29  ;;  %p435_p5 = scmp.lt.s32.totalorder %s429_s29, %s429_s29 }
   0xe   :  { %p436_p6 = por %p435_p5, %p434_p4 }
  0x10   :  { %p437_p7 = pnand %p436_p6, %p430_p3 }
  0x12   :  { %440 = shalt.err (!%p437_p7)
}
  0x13   :  { %s561_s30 = smov 128   ;;  %s562_s6 = smov 8  }
  0x14   :  { %37 = dma.hbm_to_vmem [thread:$0]  %s694_s1, 256, %s32_s19, [#allocation6], %s561_s30, %s561_s30, %s562_s6  }
  0x15   :  { %s441_s11 = scalar_lea.hbm %s696_s3, 2048 }
  0x16   :  { %p442_p8 = scmp.ne.s32.totalorder %s696_s3, %s441_s11  ;;  %p445_p9 = scmp.lt.u32.totalorder %s441_s11, %s696_s3 }
  0x18   :  { %p447_p10 = pnand %p445_p9, %p442_p8 }
  0x1a   :  { %450 = shalt.err (!%p447_p10)
}
  0x1b   :  { %s451_s16 = scalar_lea.vmem %s598_s21, 2048  ;;  %p456_p12 = scmp.lt.s32.totalorder %s598_s21, %s598_s21 }
  0x1c   :  { %p452_p11 = scmp.ne.s32.totalorder %s598_s21, %s451_s16  ;;  %p457_p13 = scmp.lt.s32.totalorder %s451_s16, %s451_s16 }
  0x1e   :  { %p458_p0 = por %p457_p13, %p456_p12 }
  0x20   :  { %p459_p1 = pnand %p458_p0, %p452_p11 }
  0x22   :  { %462 = shalt.err (!%p459_p1)
}
  0x23   :  { %59 = dma.hbm_to_vmem [thread:$0]  %s696_s3, 2048, %s598_s21, [#allocation9], %s561_s30, %s561_s30, %s562_s6  }
  0x24   :  { %s563_s18 = smov [#allocation2]   ;;  %s564_s20 = smov [#allocation7]  }
  0x25   :  { %s19_s19 = sshll.u32 %s563_s18, 4  ;;  %s44_s22 = sshll.u32 %s564_s20, 4  ;;  %s20_s19 = int_to_ptr.vmem [resolvable:$true] %s19_s19  ;;  %s45_s22 = int_to_ptr.vmem [resolvable:$true] %s44_s22 }
  0x26   :  { %s463_s25 = scalar_lea.hbm %s693_s0, 256 }
  0x27   :  { %p464_p2 = scmp.ne.s32.totalorder %s693_s0, %s463_s25  ;;  %p467_p3 = scmp.lt.u32.totalorder %s463_s25, %s693_s0 }
  0x29   :  { %p469_p4 = pnand %p467_p3, %p464_p2 }
  0x2b   :  { %472 = shalt.err (!%p469_p4)
}
  0x2c   :  { %s473_s3 = scalar_lea.vmem %s20_s19, 256  ;;  %p478_p6 = scmp.lt.s32.totalorder %s20_s19, %s20_s19 }
  0x2d   :  { %p474_p5 = scmp.ne.s32.totalorder %s20_s19, %s473_s3  ;;  %p479_p7 = scmp.lt.s32.totalorder %s473_s3, %s473_s3 }
  0x2f   :  { %p480_p8 = por %p479_p7, %p478_p6 }
  0x31   :  { %p481_p9 = pnand %p480_p8, %p474_p5 }
  0x33   :  { %484 = shalt.err (!%p481_p9)
}
  0x34   :  { %25 = dma.hbm_to_vmem [thread:$0]  %s693_s0, 256, %s20_s19, [#allocation3], %s561_s30, %s561_s30, %s562_s6  }
  0x35   :  { %s485_s10 = scalar_lea.hbm %s695_s2, 16 }
  0x36   :  { %p486_p10 = scmp.ne.s32.totalorder %s695_s2, %s485_s10  ;;  %p489_p11 = scmp.lt.u32.totalorder %s485_s10, %s695_s2 }
  0x38   :  { %p491_p12 = pnand %p489_p11, %p486_p10 }
  0x3a   :  { %494 = shalt.err (!%p491_p12)
}
  0x3b   :  { %s495_s15 = scalar_lea.vmem %s45_s22, 16  ;;  %s499_s16 = scalar_lea.vmem %s45_s22, 32 }
  0x3c   :  { %p496_p13 = scmp.ne.s32.totalorder %s45_s22, %s495_s15  ;;  %p500_p0 = scmp.lt.s32.totalorder %s45_s22, %s45_s22 }
  0x3d   :  { %p501_p1 = scmp.lt.s32.totalorder %s499_s16, %s495_s15 }
  0x3f   :  { %p502_p2 = por %p501_p1, %p500_p0 }
  0x41   :  { %p503_p3 = pnand %p502_p2, %p496_p13 }
  0x43   :  { %506 = shalt.err (!%p503_p3)
}
  0x44   :  { %47 = dma.hbm_to_vmem [thread:$0]  %s695_s2, 16, %s45_s22, [#allocation6]  }
  0x45   :  { %s565_s17 = smov [#allocation10]   ;;  %s507_s23 = scalar_lea.hbm %s697_s4, 16 }
  0x46   :  { %s66_s18 = sshll.u32 %s565_s17, 4  ;;  %p508_p4 = scmp.ne.s32.totalorder %s697_s4, %s507_s23  ;;  %s67_s18 = int_to_ptr.vmem [resolvable:$true] %s66_s18 }
  0x47   :  { %p511_p5 = scmp.lt.u32.totalorder %s507_s23, %s697_s4 }
  0x49   :  { %p513_p6 = pnand %p511_p5, %p508_p4 }
  0x4b   :  { %516 = shalt.err (!%p513_p6)
}
  0x4c   :  { %s517_s28 = scalar_lea.vmem %s67_s18, 16  ;;  %s521_s2 = scalar_lea.vmem %s67_s18, 32 }
  0x4d   :  { %p518_p7 = scmp.ne.s32.totalorder %s67_s18, %s517_s28  ;;  %p522_p8 = scmp.lt.s32.totalorder %s67_s18, %s67_s18 }
  0x4e   :  { %p523_p9 = scmp.lt.s32.totalorder %s521_s2, %s517_s28 }
  0x50   :  { %p524_p10 = por %p523_p9, %p522_p8 }
  0x52   :  { %p525_p11 = pnand %p524_p10, %p518_p7 }
  0x54   :  { %528 = shalt.err (!%p525_p11)
}
  0x55   :  { %69 = dma.hbm_to_vmem [thread:$0]  %s697_s4, 16, %s67_s18, [#allocation9]  }
  0x56   :  { %551 = dma.done.wait [#allocation3], 256  }
  0x57   :  { %552 = vsyncadd [#allocation3], 4294967040 }
  0x58   :  { %553 = dma.done.wait [#allocation6], 272  }
  0x59   :  { %554 = vsyncadd [#allocation6], 4294967024 }
  0x5a   :  { %555 = dma.done.wait [#allocation9], 2064  }
  0x5b   :  { %556 = vsyncadd [#allocation9], 4294965232  ;;  %vm103_vm0 = vcmask 1041408   ;;  %vm96_vm1 = vcmask 80896   ;;  %vm566_vm2 = vmmov 1   ;;  %v87_v0 = vld [vmem:[#allocation5] sm:$0xff] }
  0x5c   :  { %vm373_vm3 = vmpackc.low %vm103_vm0, %vm566_vm2  ;;  %v88_v1 = vld [vmem:[#allocation5 + $0x8] sm:$0x3]  ;;  %v85_v2 = vld [vmem:[#allocation2] sm:$0xff]  ;;  %s567_s4 = smov [#allocation11]  }
  0x5d   :  { %v372_v3 = vpack.c.bf16 %v88_v1, %v87_v0  ;;  %334 = vmatprep.mubr.msk.f32.mxu0 %vm96_vm1, %v85_v2  ;;  %v184_v4 = vld [vmem:[#allocation8] sm:$0xff]  ;;  %v185_v5 = vld [vmem:[#allocation8 + $0x8] sm:$0xff]  ;;  %v186_v7 = vld [vmem:[#allocation8 + $0x10] sm:$0xff]  ;;  %s289_s3 = sshll.u32 %s567_s4, 4  ;;  %s290_s3 = int_to_ptr.vmem [resolvable:$true] %s289_s3 }
  0x5e   :  { %v378_v6 = vpack.c.bf16 %v185_v5, %v184_v4  ;;  %v187_v8 = vld [vmem:[#allocation8 + $0x18] sm:$0xff]  ;;  %v188_v10 = vld [vmem:[#allocation8 + $0x20] sm:$0xff]  ;;  %v189_v11 = vld [vmem:[#allocation8 + $0x28] sm:$0xff]  ;;  %s529_s21 = scalar_lea.vmem %s290_s3, 256  ;;  %p534_p13 = scmp.lt.s32.totalorder %s290_s3, %s290_s3 }
  0x5f   :  { %374 = vmatprep.subr.msk.bf16.mxu0 %vm373_vm3, %v372_v3  ;;  %v382_v9 = vpack.c.bf16 %v187_v8, %v186_v7  ;;  %v86_v12 = vld [vmem:[#allocation2 + $0x8] sm:$0xff]  ;;  %v386_v13 = vpack.c.bf16 %v189_v11, %v188_v10  ;;  %v190_v14 = vld [vmem:[#allocation8 + $0x30] sm:$0xff]  ;;  %v191_v15 = vld [vmem:[#allocation8 + $0x38] sm:$0xff]  ;;  %p530_p12 = scmp.ne.s32.totalorder %s290_s3, %s529_s21  ;;  %p535_p0 = scmp.lt.s32.totalorder %s529_s21, %s529_s21 }
  0x60   :  { %377 = vmatpush3.bf16.msk.msra.mxu0 %vm373_vm3, %v372_v3  ;;  %379 = vmatprep.subr.bf16.mxu1 %v378_v6  ;;  %v390_v16 = vpack.c.bf16 %v191_v15, %v190_v14  ;;  %v192_v17 = vld [vmem:[#allocation8 + $0x40] sm:$0xff]  ;;  %v193_v18 = vld [vmem:[#allocation8 + $0x48] sm:$0xff]  ;;  %v194_v20 = vld [vmem:[#allocation8 + $0x50] sm:$0xff] }
  0x61   :  { %381 = vmatpush3.bf16.msra.mxu1 %v378_v6  ;;  %v394_v19 = vpack.c.bf16 %v193_v18, %v192_v17  ;;  %v195_v21 = vld [vmem:[#allocation8 + $0x58] sm:$0xff]  ;;  %v196_v23 = vld [vmem:[#allocation8 + $0x60] sm:$0xff]  ;;  %v197_v24 = vld [vmem:[#allocation8 + $0x68] sm:$0xff]  ;;  %p536_p1 = por %p535_p0, %p534_p13 }
  0x62   :  { %383 = vmatprep.subr.bf16.mxu1 %v382_v9  ;;  %v398_v22 = vpack.c.bf16 %v195_v21, %v194_v20  ;;  %v402_v25 = vpack.c.bf16 %v197_v24, %v196_v23  ;;  %v198_v26 = vld [vmem:[#allocation8 + $0x70] sm:$0xff]  ;;  %v199_v27 = vld [vmem:[#allocation8 + $0x78] sm:$0xff]  ;;  %v307_v36 = vld [vmem:[#allocation10] ss:$0 sm:$0xff] }
  0x63   :  { %335 = vmatmul.mubr.msk.f32.vlgmr.msra.gmra.mrb[0].mxu0 %vm96_vm1, %v86_v12  ;;  %v406_v28 = vpack.c.bf16 %v199_v27, %v198_v26  ;;  %v303_v29 = vld [vmem:[#allocation7] ss:$0 sm:$0xff]  ;;  %p537_p2 = pnand %p536_p1, %p530_p12 }
  0x65   :  { %385 = vmatpush3.bf16.msra.mxu1 %v382_v9 }
  0x66   :  { %387 = vmatprep.subr.bf16.mxu1 %v386_v13 }
  0x69   :  { %389 = vmatpush3.bf16.msra.mxu1 %v386_v13 }
  0x6a   :  { %391 = vmatprep.subr.bf16.mxu1 %v390_v16 }
  0x6d   :  { %393 = vmatpush3.bf16.msra.mxu1 %v390_v16 }
  0x6e   :  { %395 = vmatprep.subr.bf16.mxu1 %v394_v19 }
  0x71   :  { %397 = vmatpush3.bf16.msra.mxu1 %v394_v19 }
  0x72   :  { %399 = vmatprep.subr.bf16.mxu1 %v398_v22 }
  0x75   :  { %401 = vmatpush3.bf16.msra.mxu1 %v398_v22 }
  0x76   :  { %403 = vmatprep.subr.bf16.mxu1 %v402_v25 }
  0x79   :  { %405 = vmatpush3.bf16.msra.mxu1 %v402_v25 }
  0x7a   :  { %407 = vmatprep.subr.bf16.mxu1 %v406_v28 }
  0x7d   :  { %409 = vmatpush3.bf16.msra.mxu1 %v406_v28 }
 0x136   :  { %v336_v30 = vpop.f32.mrb[0].mxu0 }
 0x137   :  { %v179_v31 = vadd.f32 %v336_v30, %v303_v29  ;;  %v173_v32 = vpop.f32.mrb[1].mxu0 }
 0x138   :  { %v174_v33 = vadd.f32 %v303_v29, %v173_v32 }
 0x139   :  { %v183_v35 = vmax.f32 %v179_v31, 0.0 }
 0x13a   :  { %v182_v34 = vmax.f32 %v174_v33, 0.0 }
 0x13c   :  { %369 = vmatprep.mubr.f32.mxu1 %v182_v34 }
 0x13d   :  { %370 = vmatmul.mubr.f32.vlgmr.msra.gmra.mrb[0].mxu1 %v183_v35 }
 0x210   :  { %v371_v37 = vpop.f32.mrb[0].mxu1 }
 0x211   :  { %v279_v38 = vadd.f32 %v371_v37, %v307_v36  ;;  %v273_v39 = vpop.f32.mrb[1].mxu1 }
 0x212   :  { %v274_v40 = vadd.f32 %v307_v36, %v273_v39 }
 0x213   :  { %283 = vst.msk [vmem:[#allocation11 + $0x8] sm:$0xff] %vm96_vm1, %v279_v38 }
 0x214   :  { %282 = vst.msk [vmem:[#allocation11] sm:$0xff] %vm96_vm1, %v274_v40 }
 0x215   :  { %540 = shalt.err (!%p537_p2)
}
 0x216   :  { %s541_s9 = scalar_lea.hbm %s698_s5, 256 }
 0x217   :  { %p542_p3 = scmp.ne.s32.totalorder %s698_s5, %s541_s9  ;;  %p545_p4 = scmp.lt.u32.totalorder %s541_s9, %s698_s5 }
 0x219   :  { %p547_p5 = pnand %p545_p4, %p542_p3 }
 0x21b   :  { %550 = shalt.err (!%p547_p5)
}
 0x21c   :  { %295 = dma.vmem_to_hbm [thread:$0]  %s290_s3, 256, %s698_s5, [#allocation4], %s561_s30, %s561_s30, %s562_s6  }
 0x21d   :  { %557 = dma.done.wait [#allocation4], 256  }
 0x21e   :  { %558 = vsyncadd [#allocation4], 4294967040 }
 0x21f   :  { %299 = vsyncpa [#allocation3], 1 }
 0x220   :  { %300 = vsyncpa [#allocation6], 1 }
 0x221   :  { %301 = vsyncpa [#allocation9], 1 }
 0x222   :  { %302 = vsyncpa [#allocation4], 1 }

</bundles_post_ra>
